<compile_context>
chip_gen: v7x
topology: tpu7x:2x2x1
jax: 0.10.0
libtpu: 0.0.40
codegen_flags: <defaults>
</compile_context>

<pallas_src>
import functools

import jax
import jax.numpy as jnp
from jax import lax
from jax.experimental import pallas as pl
from jax.experimental.pallas import tpu as pltpu


# ----------------------------- Pallas kernel --------------------------------
def _patch_proj_kernel(p_ref, w_ref, b_ref, o_ref):
    # p_ref: (TL, K) bf16 patches tile (batch dim squeezed out of the block)
    # w_ref: (E, K)  bf16 projection weight, resident across the whole grid
    # b_ref: (E, 1)  f32  bias, resident
    # o_ref: (E, TL) f32  output tile (transposed layout -> (B, E, L) array)
    acc = lax.dot_general(
        w_ref[...], p_ref[...],
        dimension_numbers=(((1,), (1,)), ((), ())),   # contract both K dims (B^T matmul)
        preferred_element_type=jnp.float32,
    )                                                  # (E, TL), fp32 MXU accumulate
    o_ref[...] = (acc + b_ref[...]).astype(o_ref.dtype)


def _patch_proj(patches, w_ek, bias, *, out_dtype=jnp.float32):
    """patches: (B, L, K) bf16; w_ek: (E, K) bf16; bias: (E,) f32 -> (B, E, L) f32."""
    B, L, K = patches.shape
    E = w_ek.shape[0]

    # Tile the L (token) axis: multiple of 128 when large, else the full extent
    # (both satisfy the (8,128)/full-dim block constraint).
    TL = L if L <= 512 else 512
    n_l = pl.cdiv(L, TL)

    bias2d = bias.reshape(E, 1).astype(jnp.float32)

    flops = 2 * B * L * K * E
    bytes_accessed = (patches.size * patches.dtype.itemsize
                      + w_ek.size * w_ek.dtype.itemsize
                      + bias2d.size * 4
                      + B * E * L * 4)

    return pl.pallas_call(
        _patch_proj_kernel,
        out_shape=jax.ShapeDtypeStruct((B, E, L), out_dtype),
        grid=(B, n_l),
        in_specs=[
            pl.BlockSpec((None, TL, K), lambda b, l: (b, l, 0)),   # patches tile
            pl.BlockSpec((E, K), lambda b, l: (0, 0)),             # weight (resident)
            pl.BlockSpec((E, 1), lambda b, l: (0, 0)),             # bias (resident)
        ],
        out_specs=pl.BlockSpec((None, E, TL), lambda b, l: (b, 0, l)),
        compiler_params=pltpu.CompilerParams(
            dimension_semantics=("parallel", "parallel"),
            vmem_limit_bytes=32 * 1024 * 1024,
            # Let XLA fuse the patch-gather producer into the Pallas input.
            allow_input_fusion=[True, False, False],
        ),
        cost_estimate=pl.CostEstimate(
            flops=flops, transcendentals=0, bytes_accessed=bytes_accessed),
    )(patches, w_ek, bias2d)


# ------------------------------ PatchEmbed -----------------------------------
def patch_embed_forward(x, weight, bias, patch_size):
    """Equivalent of PatchEmbed.forward with norm_layer=None.

    x:      (B, C, H, W)  float32, NCHW
    weight: (E, C, ps, ps) conv weight (PyTorch layout)
    bias:   (E,)
    returns (B, E, Wh, Ww) float32
    """
    ps_h, ps_w = patch_size
    B, C, H, W = x.shape
    E = weight.shape[0]

    # F.pad semantics: pad right edge of W, then bottom edge of H, with zeros.
    if W % ps_w != 0:
        pad_w = ps_w - W % ps_w
        x = jnp.pad(x, ((0, 0), (0, 0), (0, 0), (0, pad_w)))
        W = W + pad_w
    if H % ps_h != 0:
        pad_h = ps_h - H % ps_h
        x = jnp.pad(x, ((0, 0), (0, 0), (0, pad_h), (0, 0)))
        H = H + pad_h

    Wh, Ww = H // ps_h, W // ps_w
    K = C * ps_h * ps_w

    # Non-overlapping patch gather; flatten each patch in (C, i, j) order to
    # match the PyTorch conv-weight flattening. Streamed operands cast to bf16.
    xp = x.reshape(B, C, Wh, ps_h, Ww, ps_w)
    xp = jnp.transpose(xp, (0, 2, 4, 1, 3, 5))            # (B, Wh, Ww, C, ps, ps)
    patches = xp.reshape(B, Wh * Ww, K).astype(jnp.bfloat16)   # (B, L, K)

    w_ek = weight.reshape(E, K).astype(jnp.bfloat16)      # (E, K)

    out = _patch_proj(patches, w_ek, bias)                # (B, E, L) f32 -- Pallas

    # Free (metadata-only) reshape back to the NCHW conv output layout.
    return out.reshape(B, E, Wh, Ww)


# ------------------------------- main ----------------------------------------
if __name__ == "__main__":
    key = jax.random.PRNGKey(0)
    k_x, k_w, k_b = jax.random.split(key, 3)

    patch_size = (4, 4)
    in_chans = 3
    embed_dim = 128
    B, H, W = 2, 16, 16

    x = jax.random.normal(k_x, (B, in_chans, H, W), dtype=jnp.float32)
    weight = jax.random.normal(
        k_w, (embed_dim, in_chans, patch_size[0], patch_size[1]),
        dtype=jnp.float32) * 0.02
    bias = jax.random.normal(k_b, (embed_dim,), dtype=jnp.float32) * 0.02

    fwd = jax.jit(functools.partial(patch_embed_forward, patch_size=patch_size))
    out = jax.block_until_ready(fwd(x, weight, bias))

    # Reference: XLA conv in full fp32 (same semantics as nn.Conv2d).
    ref = lax.conv_general_dilated(
        x, weight,
        window_strides=patch_size,
        padding="VALID",
        dimension_numbers=("NCHW", "OIHW", "NCHW"),
        precision=lax.Precision.HIGHEST,
    ) + bias.reshape(1, embed_dim, 1, 1)

    assert out.shape == (B, embed_dim, H // patch_size[0], W // patch_size[1])
    # bf16 streamed operands with fp32 accumulate -> looser tolerance than pure fp32.
    assert jnp.allclose(out, ref, atol=1e-2, rtol=1e-2), "mismatch vs conv reference"

    print("KERNEL_OK")
</pallas_src>

<mosaic_0001>
module attributes {stable_mosaic.version = 11 : i64} {
  func.func @_patch_proj_kernel(%arg0: i32, %arg1: i32, %arg2: memref<1x16x48xbf16, #tpu.memory_space<vmem>>, %arg3: memref<128x48xbf16, #tpu.memory_space<vmem>>, %arg4: memref<128x1xf32, #tpu.memory_space<vmem>>, %arg5: memref<1x128x16xf32, #tpu.memory_space<vmem>>) attributes {dimension_semantics = [#tpu.dimension_semantics<parallel>, #tpu.dimension_semantics<parallel>], iteration_bounds = array<i64: 2, 1>, scalar_prefetch = 0 : i64, scratch_operands = 0 : i64, tpu.core_type = #tpu.core_type<tc>, window_params = [{transform_indices = @transform_0, window_bounds = array<i64: 1, 16, 48>}, {pipeline_mode = #tpu.pipeline_mode<synchronous>, transform_indices = @transform_1, window_bounds = array<i64: 128, 48>}, {pipeline_mode = #tpu.pipeline_mode<synchronous>, transform_indices = @transform_2, window_bounds = array<i64: 128, 1>}, {transform_indices = @transform_3, window_bounds = array<i64: 1, 128, 16>}]} {
    %c0 = arith.constant 0 : index
    %c0_0 = arith.constant 0 : index
    %0 = vector.load %arg3[%c0, %c0_0] : memref<128x48xbf16, #tpu.memory_space<vmem>>, vector<128x48xbf16>
    %c0_1 = arith.constant 0 : index
    %c0_2 = arith.constant 0 : index
    %c0_3 = arith.constant 0 : index
    %1 = vector.load %arg2[%c0_1, %c0_2, %c0_3] : memref<1x16x48xbf16, #tpu.memory_space<vmem>>, vector<1x16x48xbf16>
    %2 = vector.shape_cast %1 : vector<1x16x48xbf16> to vector<16x48xbf16>
    %cst = arith.constant dense<0.000000e+00> : vector<128x16xf32>
    %3 = tpu.matmul %0, %2, %cst {dimension_numbers = #tpu.dot_dimension_numbers<[1], [1], [0], [0], [0, 0, 1, 0], [], []>} : vector<128x48xbf16>, vector<16x48xbf16>, vector<128x16xf32> -> vector<128x16xf32>
    %c0_4 = arith.constant 0 : index
    %c0_5 = arith.constant 0 : index
    %4 = vector.load %arg4[%c0_4, %c0_5] : memref<128x1xf32, #tpu.memory_space<vmem>>, vector<128x1xf32>
    %5 = vector.broadcast %4 : vector<128x1xf32> to vector<128x16xf32>
    %6 = arith.addf %3, %5 : vector<128x16xf32>
    %c0_6 = arith.constant 0 : index
    %c0_7 = arith.constant 0 : index
    %c0_8 = arith.constant 0 : index
    %7 = vector.load %arg5[%c0_6, %c0_7, %c0_8] : memref<1x128x16xf32, #tpu.memory_space<vmem>>, vector<1x128x16xf32>
    %8 = vector.shape_cast %7 : vector<1x128x16xf32> to vector<128x16xf32>
    %9 = vector.shape_cast %6 : vector<128x16xf32> to vector<1x128x16xf32>
    tpu.vector_store %arg5[%c0_6, %c0_7, %c0_8], %9 {strides = array<i32>} : memref<1x128x16xf32, #tpu.memory_space<vmem>>, vector<1x128x16xf32>,
    return
  }
  func.func @transform_0(%arg0: i32, %arg1: i32) -> (i32, i32, i32) {
    %c0_i32 = arith.constant 0 : i32
    %c0_i32_0 = arith.constant 0 : i32
    return %arg0, %arg1, %c0_i32 : i32, i32, i32
  }
  func.func @transform_1(%arg0: i32, %arg1: i32) -> (i32, i32) {
    %c0_i32 = arith.constant 0 : i32
    %c0_i32_0 = arith.constant 0 : i32
    %c0_i32_1 = arith.constant 0 : i32
    return %c0_i32, %c0_i32_0 : i32, i32
  }
  func.func @transform_2(%arg0: i32, %arg1: i32) -> (i32, i32) {
    %c0_i32 = arith.constant 0 : i32
    %c0_i32_0 = arith.constant 0 : i32
    %c0_i32_1 = arith.constant 0 : i32
    return %c0_i32, %c0_i32_0 : i32, i32
  }
  func.func @transform_3(%arg0: i32, %arg1: i32) -> (i32, i32, i32) {
    %c0_i32 = arith.constant 0 : i32
    %c0_i32_0 = arith.constant 0 : i32
    return %arg0, %c0_i32, %arg1 : i32, i32, i32
  }
}

</mosaic_0001>

<bundles_post_ra>
// kernel: patch_embed_forward.1
= control target key start
LH: loop header
LB: loop body
LE: loop exit
PB: predicated region body
PF: predicated region fallthrough
CT: control target
= control target key end

     0   :  { %s734_s12 = smov 0   ;;  %s736_s13 = smov 0   ;;  %s888_s0 = inlined_call_operand.vmem [shape: bf16[2,16,48], index: 0, kind: input, shape index: {}]   ;;  %s889_s1 = inlined_call_operand.vmem [shape: bf16[128,48], index: 1, kind: input, shape index: {}]   ;;  %s890_s2 = inlined_call_operand.vmem [shape: f32[128,1], index: 2, kind: input, shape index: {}]   ;;  %s891_s3 = inlined_call_operand.vmem [shape: f32[2,128,16], index: 3, kind: output, shape index: {}]  }
   0x1   :  { %s738_s14 = smov 0  }
   0x2 LB: > { %s25_s15 = sadd.s32 1, %s707_s13  ;;  %p596_p0 = scmp.ge.s32.totalorder %s711_s14, 1  ;;  %s711_s14 = sphi %s738_s14, %s13_s14   ;;  %s707_s13 = sphi %s736_s13, %s893_s13   ;;  %s703_s12 = sphi %s734_s12, %s892_s12  }
   0x3   : > { %p27_p1 = scmp.ge.s32.totalorder %s25_s15, 2  ;;  %p158_p2 = scmp.lt.s32.totalorder %s711_s14, 3 }
   0x5   : > { %s895_s15 = smov (%p27_p1, %s25_s15), 0  ;;  %p159_p3 = pnand %p596_p0, %p158_p2 }
   0x6   : > { %p190_p4 = scmp.lt.s32.totalorder (!%p159_p3), %s703_s12, 1  ;;  %vm367_vm0 = vcmask (!%p159_p3), 392192   ;;  %v681_v0 = vld [vmem:[%s889_s1] sm:$0xff] (!%p159_p3)   ;;  %v713_v2 = vmov (!%p159_p3), 0   ;;  %v228_v5 = vld [vmem:[%s890_s2 + $0x10] sm:$0xff] (!%p159_p3)  ;;  %v229_v7 = vld [vmem:[%s890_s2 + $0x18] sm:$0xff] (!%p159_p3) }
   0x7   : > { %162 = sbr.rel (%p159_p3) target bundleno = 252 (0xfc), region = 32  ;;  %v682_v1 = vld [vmem:[%s889_s1 + $0x20] sm:$0xff] (!%p159_p3)   ;;  %679 = vset.pattern.permute.xlu1 (!%p159_p3), %v713_v2  ;;  %678 = vset.pattern.permute.xlu0 (!%p159_p3), %v713_v2  ;;  %v227_v8 = vld [vmem:[%s890_s2 + $0x8] sm:$0xff] (!%p159_p3)  ;;  %v685_v11 = vld [vmem:[%s889_s1 + $0x10] sm:$0xff] (!%p159_p3)   ;;  %vm492_vm1 = vcmask (!%p159_p3), 130048  }
   0x8   : > { %633 = vmatprep.mubr.msk.bf16.mxu0 (!%p159_p3), %vm367_vm0, %v681_v0  ;;  %641 = vmatprep.mubr.msk.bf16.mxu1 (!%p159_p3), %vm367_vm0, %v682_v1  ;;  %v226_v6 = vld [vmem:[%s890_s2] sm:$0xff] (!%p159_p3)  ;;  %v683_v9 = vld [vmem:[%s889_s1 + $0x8] sm:$0xff] (!%p159_p3)   ;;  %v686_v12 = vld [vmem:[%s889_s1 + $0x30] sm:$0xff] (!%p159_p3)  }
   0x9   : > { %254 = vperm.xlu1 (!%p159_p3), %679, %v228_v5   ;;  %244 = vperm.xlu0 (!%p159_p3), %678, %v226_v6   ;;  %v684_v10 = vld [vmem:[%s889_s1 + $0x28] sm:$0xff] (!%p159_p3)   ;;  %v230_v14 = vld [vmem:[%s890_s2 + $0x20] sm:$0xff] (!%p159_p3)  ;;  %v233_v15 = vld [vmem:[%s890_s2 + $0x38] sm:$0xff] (!%p159_p3) }
   0xa   : > { %v231_v13 = vld [vmem:[%s890_s2 + $0x28] sm:$0xff] (!%p159_p3)  ;;  %v232_v16 = vld [vmem:[%s890_s2 + $0x30] sm:$0xff] (!%p159_p3)  ;;  %v687_v17 = vld [vmem:[%s889_s1 + $0x18] sm:$0xff] (!%p159_p3)  }
   0xb   : > { %v688_v18 = vld [vmem:[%s889_s1 + $0x38] sm:$0xff] (!%p159_p3)   ;;  %v235_v19 = vld [vmem:[%s890_s2 + $0x48] sm:$0xff] (!%p159_p3)  ;;  %v234_v20 = vld [vmem:[%s890_s2 + $0x40] sm:$0xff] (!%p159_p3) }
   0xc   : > { %v237_v21 = vld [vmem:[%s890_s2 + $0x58] sm:$0xff] (!%p159_p3)  ;;  %v236_v22 = vld [vmem:[%s890_s2 + $0x50] sm:$0xff] (!%p159_p3)  ;;  %v239_v23 = vld [vmem:[%s890_s2 + $0x68] sm:$0xff] (!%p159_p3) }
   0xd   : > { %259 = vperm.xlu1 (!%p159_p3), %679, %v229_v7   ;;  %249 = vperm.xlu0 (!%p159_p3), %678, %v227_v8   ;;  %v238_v24 = vld [vmem:[%s890_s2 + $0x60] sm:$0xff] (!%p159_p3)  ;;  %v241_v25 = vld [vmem:[%s890_s2 + $0x78] sm:$0xff] (!%p159_p3)  ;;  %v240_v26 = vld [vmem:[%s890_s2 + $0x70] sm:$0xff] (!%p159_p3) }
   0xe   : > { %s897_s12 = smov (!%p190_p4, %s703_s12), 1 }
   0xf   : > { %s620_s20 = sshll.u32 %s897_s12, 3  ;;  %s621_s22 = sshll.u32 %s897_s12, 7 }
  0x10   : > { %s197_s23 = scalar_lea.vmem %s888_s0, %s620_s20  ;;  %s845_s25 = scalar_lea.vmem %s891_s3, %s621_s22 }
  0x11   : > { %v680_v3 = vld [vmem:[%s197_s23] sm:$0xff]   ;;  %269 = vperm.xlu1 %679, %v231_v13   ;;  %264 = vperm.xlu0 %678, %v230_v14  }
  0x12   : > { %651 = vmatprep.subr.msk.bf16.mxu0 %vm367_vm0, %v680_v3  ;;  %652 = vmatprep.subr.msk.bf16.mxu1 %vm367_vm0, %v680_v3  ;;  %v393_v4 = vsel %vm367_vm0, %v680_v3, 0 }
  0x13   : > { %632 = vmatpush3.bf16.xpose.msra.mxu0 %v393_v4  ;;  %650 = vmatpush3.bf16.xpose.msra.mxu1 %v393_v4 }
  0x15   : > { %279 = vperm.xlu1 %679, %v233_v15   ;;  %274 = vperm.xlu0 %678, %v232_v16  }
  0x19   : > { %289 = vperm.xlu1 %679, %v235_v19   ;;  %284 = vperm.xlu0 %678, %v234_v20  }
  0x1a   : > { %634 = vmatmul.mubr.msk.bf16.vlgmr.msra.gmra.mrb[0].mxu0 %vm367_vm0, %v683_v9  ;;  %642 = vmatmul.mubr.msk.bf16.vlgmr.msra.gmra.mrb[0].mxu1 %vm367_vm0, %v684_v10 }
  0x1b   : > { %637 = vmatprep.mubr.msk.bf16.mxu0 %vm367_vm0, %v685_v11  ;;  %645 = vmatprep.mubr.msk.bf16.mxu1 %vm367_vm0, %v686_v12 }
  0x1d   : > { %299 = vperm.xlu1 %679, %v237_v21   ;;  %294 = vperm.xlu0 %678, %v236_v22  }
  0x21   : > { %309 = vperm.xlu1 %679, %v239_v23   ;;  %304 = vperm.xlu0 %678, %v238_v24  }
  0x22   : > { %638 = vmatmul.mubr.msk.bf16.gmra.mrb[4].mxu0 %vm367_vm0, %v687_v17  ;;  %646 = vmatmul.mubr.msk.bf16.gmra.mrb[4].mxu1 %vm367_vm0, %v688_v18 }
  0x25   : > { %319 = vperm.xlu1 %679, %v241_v25   ;;  %314 = vperm.xlu0 %678, %v240_v26  }
  0x88   : > { %v255_v27 = vpop.permute.xlu1 %254  ;;  %v245_v28 = vpop.permute.xlu0 %244 }
  0x8c   : > { %v260_v29 = vpop.permute.xlu1 %259  ;;  %v250_v30 = vpop.permute.xlu0 %249 }
  0x90   : > { %v270_v31 = vpop.permute.xlu1 %269  ;;  %v265_v32 = vpop.permute.xlu0 %264 }
  0x94   : > { %v280_v33 = vpop.permute.xlu1 %279  ;;  %v275_v34 = vpop.permute.xlu0 %274 }
  0x98   : > { %v290_v35 = vpop.permute.xlu1 %289  ;;  %v285_v36 = vpop.permute.xlu0 %284 }
  0x9c   : > { %v300_v37 = vpop.permute.xlu1 %299  ;;  %v295_v38 = vpop.permute.xlu0 %294 }
  0xa0   : > { %v310_v39 = vpop.permute.xlu1 %309  ;;  %v305_v40 = vpop.permute.xlu0 %304 }
  0xa4   : > { %v320_v57 = vpop.permute.xlu1 %319  ;;  %v315_v58 = vpop.permute.xlu0 %314 }
  0xed   : > { %v635_v41 = vpop.f32.mrb[0].mxu0  ;;  %v643_v42 = vpop.f32.mrb[0].mxu1 }
  0xee   : > { %v438_v43 = vadd.f32 %v635_v41, %v255_v27  ;;  %v470_v44 = vadd.f32 %v643_v42, %v295_v38  ;;  %v429_v45 = vpop.f32.mrb[1].mxu0  ;;  %v461_v46 = vpop.f32.mrb[1].mxu1 }
  0xef   : > { %v430_v47 = vadd.f32 %v429_v45, %v245_v28  ;;  %v462_v48 = vadd.f32 %v461_v46, %v285_v36  ;;  %v636_v49 = vpop.f32.mrb[2].mxu0  ;;  %v644_v50 = vpop.f32.mrb[2].mxu1 }
  0xf0   : > { %495 = vst.msk [vmem:[%s845_s25 + $0x10] sm:$0xff] %vm492_vm1, %v438_v43  ;;  %503 = vst.msk [vmem:[%s845_s25 + $0x50] sm:$0xff] %vm492_vm1, %v470_v44  ;;  %v441_v51 = vadd.f32 %v636_v49, %v260_v29  ;;  %v473_v52 = vadd.f32 %v644_v50, %v300_v37  ;;  %v432_v53 = vpop.f32.mrb[3].mxu0  ;;  %v464_v54 = vpop.f32.mrb[3].mxu1 }
  0xf1   : > { %493 = vst.msk [vmem:[%s845_s25] sm:$0xff] %vm492_vm1, %v430_v47  ;;  %501 = vst.msk [vmem:[%s845_s25 + $0x40] sm:$0xff] %vm492_vm1, %v462_v48  ;;  %v433_v55 = vadd.f32 %v432_v53, %v250_v30  ;;  %v465_v56 = vadd.f32 %v464_v54, %v290_v35 }
  0xf2   : > { %496 = vst.msk [vmem:[%s845_s25 + $0x18] sm:$0xff] %vm492_vm1, %v441_v51  ;;  %504 = vst.msk [vmem:[%s845_s25 + $0x58] sm:$0xff] %vm492_vm1, %v473_v52 }
  0xf3   : > { %494 = vst.msk [vmem:[%s845_s25 + $0x8] sm:$0xff] %vm492_vm1, %v433_v55  ;;  %502 = vst.msk [vmem:[%s845_s25 + $0x48] sm:$0xff] %vm492_vm1, %v465_v56 }
  0xf5   : > { %v639_v59 = vpop.f32.mrb[4].mxu0  ;;  %v647_v60 = vpop.f32.mrb[4].mxu1 }
  0xf6   : > { %v454_v61 = vadd.f32 %v639_v59, %v275_v34  ;;  %v486_v62 = vadd.f32 %v647_v60, %v315_v58  ;;  %v445_v63 = vpop.f32.mrb[5].mxu0  ;;  %v477_v0 = vpop.f32.mrb[5].mxu1 }
  0xf7   : > { %v446_v1 = vadd.f32 %v445_v63, %v265_v32  ;;  %v478_v2 = vadd.f32 %v477_v0, %v305_v40  ;;  %v640_v3 = vpop.f32.mrb[6].mxu0  ;;  %v648_v4 = vpop.f32.mrb[6].mxu1 }
  0xf8   : > { %499 = vst.msk [vmem:[%s845_s25 + $0x30] sm:$0xff] %vm492_vm1, %v454_v61  ;;  %507 = vst.msk [vmem:[%s845_s25 + $0x70] sm:$0xff] %vm492_vm1, %v486_v62  ;;  %v457_v5 = vadd.f32 %v640_v3, %v280_v33  ;;  %v489_v6 = vadd.f32 %v648_v4, %v320_v57  ;;  %v448_v7 = vpop.f32.mrb[7].mxu0  ;;  %v480_v8 = vpop.f32.mrb[7].mxu1 }
  0xf9   : > { %497 = vst.msk [vmem:[%s845_s25 + $0x20] sm:$0xff] %vm492_vm1, %v446_v1  ;;  %505 = vst.msk [vmem:[%s845_s25 + $0x60] sm:$0xff] %vm492_vm1, %v478_v2  ;;  %v449_v9 = vadd.f32 %v448_v7, %v270_v31  ;;  %v481_v10 = vadd.f32 %v480_v8, %v310_v39 }
  0xfa   : > { %500 = vst.msk [vmem:[%s845_s25 + $0x38] sm:$0xff] %vm492_vm1, %v457_v5  ;;  %508 = vst.msk [vmem:[%s845_s25 + $0x78] sm:$0xff] %vm492_vm1, %v489_v6 }
  0xfb   : > { %498 = vst.msk [vmem:[%s845_s25 + $0x28] sm:$0xff] %vm492_vm1, %v449_v9  ;;  %506 = vst.msk [vmem:[%s845_s25 + $0x68] sm:$0xff] %vm492_vm1, %v481_v10 }
  0xfc PF: > { %s13_s14 = sadd.s32 1, %s711_s14   ;;  %s892_s12 = smov %s707_s13 }
  0xfd   : > { %p10_p5 = scmp.ge.s32.totalorder %s13_s14, 4   ;;  %s893_s13 = smov %s895_s15 }
  0xff   :  { %12 = sbr.rel (!%p10_p5) target bundleno = 2 (0x2), region = 62 }

</bundles_post_ra>
